<compile_context>
chip_gen: v7x
topology: tpu7x:2x2x1
jax: 0.10.0
libtpu: 0.0.40
codegen_flags: <defaults>
</compile_context>

<pallas_src>
import jax
import jax.numpy as jnp
from jax.experimental import pallas as pl
from jax.experimental.pallas import tpu as pltpu

IN_DIM = 784
HID_DIM = 128
OUT_DIM = 10
OUT_PAD = 128    # lane-dense output (real logits live in cols [:10])


def _cdiv(a, b):
    return -(-a // b)


def _round_up(n, m):
    return _cdiv(n, m) * m


def _select_tile(B, tb):
    """Pick a batch tile: <= tb rows, multiple of 16, padding bounded to < 16 rows,
    and >= 2 grid steps for large batches (v7x megacore sharding)."""
    n_tiles = max(_cdiv(B, tb), 1)
    if n_tiles == 1 and B >= 1024:
        n_tiles = 2                       # keep both TensorCores busy on v7x
    return _round_up(_cdiv(B, n_tiles), 16)


def mlp_kernel(x_ref, w1_ref, b1_ref, w2_ref, b2_ref, o_ref):
    # Cast activations to bf16 in-kernel (VPU, hidden under the x DMA) — the HBM stream
    # stays whatever dtype the producer gave us, with no extra wrapper pass.
    x = x_ref[...].astype(jnp.bfloat16)
    # fc1: bf16 MXU matmul, f32 accumulate, bias + ReLU in f32.
    h = jnp.dot(x, w1_ref[...], preferred_element_type=jnp.float32)
    h = jnp.maximum(h + b1_ref[...], 0.0)
    # fc2: back to bf16 for the MXU, f32 accumulate, bias in f32.
    y = jnp.dot(h.astype(jnp.bfloat16), w2_ref[...],
                preferred_element_type=jnp.float32)
    o_ref[...] = (y + b2_ref[...]).astype(o_ref.dtype)


def simple_nn_forward(x, w1, b1, w2, b2, *, tb=2048):
    """x: (B, 784) f32; w1: (784,128); b1: (128,); w2: (128,10); b2: (10,)."""
    B = x.shape[0]

    TB = _select_tile(B, tb)
    B_pad = _round_up(B, TB)

    # Only batch-dim zero padding (no dtype conversion, no feature padding) — and only
    # when B is not already a tile multiple. Padding is < 16 rows for big batches.
    x_p = x if B_pad == B else jnp.pad(x, ((0, B_pad - B), (0, 0)))

    # Weights/biases: tiny one-time casts / pads (resident in VMEM across the grid).
    w1_p = w1.astype(jnp.bfloat16)                                   # (784, 128)
    b1_p = b1.reshape(1, HID_DIM).astype(jnp.float32)                # (1, 128)
    w2_p = jnp.pad(w2.astype(jnp.bfloat16),
                   ((0, 0), (0, OUT_PAD - OUT_DIM)))                 # (128, 128)
    b2_p = jnp.pad(b2.astype(jnp.float32),
                   (0, OUT_PAD - OUT_DIM)).reshape(1, OUT_PAD)       # (1, 128)

    grid = (B_pad // TB,)

    out = pl.pallas_call(
        mlp_kernel,
        out_shape=jax.ShapeDtypeStruct((B_pad, OUT_PAD), jnp.float32),
        grid=grid,
        in_specs=[
            # x: streamed; 784 == full array dim so the (8,128) rule is satisfied.
            pl.BlockSpec((TB, IN_DIM), lambda i: (i, 0)),
            pl.BlockSpec((IN_DIM, HID_DIM), lambda i: (0, 0)),   # w1: resident
            pl.BlockSpec((1, HID_DIM), lambda i: (0, 0)),        # b1: resident
            pl.BlockSpec((HID_DIM, OUT_PAD), lambda i: (0, 0)),  # w2: resident
            pl.BlockSpec((1, OUT_PAD), lambda i: (0, 0)),        # b2: resident
        ],
        out_specs=pl.BlockSpec((TB, OUT_PAD), lambda i: (i, 0)),
        compiler_params=pltpu.CompilerParams(
            dimension_semantics=("parallel",),
            # Double-buffered f32 x tile at TB=2048 is ~12.5 MiB; raise the scoped VMEM
            # limit past v5e's 16 MiB default (fits v6e/v7x defaults & physical limits).
            vmem_limit_bytes=48 * 1024 * 1024,
        ),
    )(x_p, w1_p, b1_p, w2_p, b2_p)

    return out[:B, :OUT_DIM]


def init_params(key):
    # Deterministic init mimicking torch.nn.Linear: U(-1/sqrt(fan_in), 1/sqrt(fan_in)).
    k1, k2, k3, k4 = jax.random.split(key, 4)
    bound1 = 1.0 / (IN_DIM ** 0.5)
    bound2 = 1.0 / (HID_DIM ** 0.5)
    w1 = jax.random.uniform(k1, (IN_DIM, HID_DIM), jnp.float32, -bound1, bound1)
    b1 = jax.random.uniform(k2, (HID_DIM,), jnp.float32, -bound1, bound1)
    w2 = jax.random.uniform(k3, (HID_DIM, OUT_DIM), jnp.float32, -bound2, bound2)
    b2 = jax.random.uniform(k4, (OUT_DIM,), jnp.float32, -bound2, bound2)
    return w1, b1, w2, b2


if __name__ == "__main__":
    key = jax.random.PRNGKey(0)
    kx, kp = jax.random.split(key)
    B = 8
    x = jax.random.normal(kx, (B, IN_DIM), jnp.float32)
    w1, b1, w2, b2 = init_params(kp)

    out = simple_nn_forward(x, w1, b1, w2, b2)
    jax.block_until_ready(out)
    assert out.shape == (B, OUT_DIM)

    # Reference with the same bf16-input / f32-accumulate numerics as the kernel.
    xb, w1b, w2b = (a.astype(jnp.bfloat16) for a in (x, w1, w2))
    h_ref = jnp.maximum(
        jnp.dot(xb, w1b, preferred_element_type=jnp.float32) + b1[None, :], 0.0)
    ref = jnp.dot(h_ref.astype(jnp.bfloat16), w2b,
                  preferred_element_type=jnp.float32) + b2[None, :]
    assert jnp.allclose(out, ref, atol=1e-2, rtol=1e-2)

    # Loose sanity check against the full-f32 math of the original module.
    ref_f32 = jnp.maximum(x @ w1 + b1[None, :], 0.0) @ w2 + b2[None, :]
    assert jnp.allclose(out, ref_f32, atol=5e-2, rtol=5e-2)

    print("KERNEL_OK")
</pallas_src>

<mosaic_0001>
module attributes {stable_mosaic.version = 11 : i64} {
  func.func @mlp_kernel(%arg0: i32, %arg1: memref<16x784xf32, #tpu.memory_space<vmem>>, %arg2: memref<784x128xbf16, #tpu.memory_space<vmem>>, %arg3: memref<1x128xf32, #tpu.memory_space<vmem>>, %arg4: memref<128x128xbf16, #tpu.memory_space<vmem>>, %arg5: memref<1x128xf32, #tpu.memory_space<vmem>>, %arg6: memref<16x128xf32, #tpu.memory_space<vmem>>) attributes {dimension_semantics = [#tpu.dimension_semantics<parallel>], iteration_bounds = array<i64: 1>, scalar_prefetch = 0 : i64, scratch_operands = 0 : i64, tpu.core_type = #tpu.core_type<tc>, window_params = [{transform_indices = @transform_0, window_bounds = array<i64: 16, 784>}, {pipeline_mode = #tpu.pipeline_mode<synchronous>, transform_indices = @transform_1, window_bounds = array<i64: 784, 128>}, {pipeline_mode = #tpu.pipeline_mode<synchronous>, transform_indices = @transform_2, window_bounds = array<i64: 1, 128>}, {pipeline_mode = #tpu.pipeline_mode<synchronous>, transform_indices = @transform_3, window_bounds = array<i64: 128, 128>}, {pipeline_mode = #tpu.pipeline_mode<synchronous>, transform_indices = @transform_4, window_bounds = array<i64: 1, 128>}, {transform_indices = @transform_5, window_bounds = array<i64: 16, 128>}]} {
    %c0 = arith.constant 0 : index
    %c0_0 = arith.constant 0 : index
    %0 = vector.load %arg1[%c0, %c0_0] : memref<16x784xf32, #tpu.memory_space<vmem>>, vector<16x784xf32>
    %1 = arith.truncf %0 : vector<16x784xf32> to vector<16x784xbf16>
    %c0_1 = arith.constant 0 : index
    %c0_2 = arith.constant 0 : index
    %2 = vector.load %arg2[%c0_1, %c0_2] : memref<784x128xbf16, #tpu.memory_space<vmem>>, vector<784x128xbf16>
    %cst = arith.constant dense<0.000000e+00> : vector<16x128xf32>
    %3 = tpu.matmul %1, %2, %cst {dimension_numbers = #tpu.dot_dimension_numbers<[1], [0], [0], [1], [0, 0, 1, 1], [], []>} : vector<16x784xbf16>, vector<784x128xbf16>, vector<16x128xf32> -> vector<16x128xf32>
    %c0_3 = arith.constant 0 : index
    %c0_4 = arith.constant 0 : index
    %4 = vector.load %arg3[%c0_3, %c0_4] : memref<1x128xf32, #tpu.memory_space<vmem>>, vector<1x128xf32>
    %5 = vector.broadcast %4 : vector<1x128xf32> to vector<16x128xf32>
    %6 = arith.addf %3, %5 : vector<16x128xf32>
    %cst_5 = arith.constant 0.000000e+00 : f32
    %7 = vector.broadcast %cst_5 : f32 to vector<16x128xf32>
    %8 = arith.maximumf %6, %7 : vector<16x128xf32>
    %9 = arith.truncf %8 : vector<16x128xf32> to vector<16x128xbf16>
    %c0_6 = arith.constant 0 : index
    %c0_7 = arith.constant 0 : index
    %10 = vector.load %arg4[%c0_6, %c0_7] : memref<128x128xbf16, #tpu.memory_space<vmem>>, vector<128x128xbf16>
    %cst_8 = arith.constant dense<0.000000e+00> : vector<16x128xf32>
    %11 = tpu.matmul %9, %10, %cst_8 {dimension_numbers = #tpu.dot_dimension_numbers<[1], [0], [0], [1], [0, 0, 1, 1], [], []>} : vector<16x128xbf16>, vector<128x128xbf16>, vector<16x128xf32> -> vector<16x128xf32>
    %c0_9 = arith.constant 0 : index
    %c0_10 = arith.constant 0 : index
    %12 = vector.load %arg5[%c0_9, %c0_10] : memref<1x128xf32, #tpu.memory_space<vmem>>, vector<1x128xf32>
    %13 = vector.broadcast %12 : vector<1x128xf32> to vector<16x128xf32>
    %14 = arith.addf %11, %13 : vector<16x128xf32>
    %c0_11 = arith.constant 0 : index
    %c0_12 = arith.constant 0 : index
    %15 = vector.load %arg6[%c0_11, %c0_12] : memref<16x128xf32, #tpu.memory_space<vmem>>, vector<16x128xf32>
    tpu.vector_store %arg6[%c0_11, %c0_12], %14 {strides = array<i32>} : memref<16x128xf32, #tpu.memory_space<vmem>>, vector<16x128xf32>,
    return
  }
  func.func @transform_0(%arg0: i32) -> (i32, i32) {
    %c0_i32 = arith.constant 0 : i32
    %c0_i32_0 = arith.constant 0 : i32
    return %arg0, %c0_i32 : i32, i32
  }
  func.func @transform_1(%arg0: i32) -> (i32, i32) {
    %c0_i32 = arith.constant 0 : i32
    %c0_i32_0 = arith.constant 0 : i32
    %c0_i32_1 = arith.constant 0 : i32
    return %c0_i32, %c0_i32_0 : i32, i32
  }
  func.func @transform_2(%arg0: i32) -> (i32, i32) {
    %c0_i32 = arith.constant 0 : i32
    %c0_i32_0 = arith.constant 0 : i32
    %c0_i32_1 = arith.constant 0 : i32
    return %c0_i32, %c0_i32_0 : i32, i32
  }
  func.func @transform_3(%arg0: i32) -> (i32, i32) {
    %c0_i32 = arith.constant 0 : i32
    %c0_i32_0 = arith.constant 0 : i32
    %c0_i32_1 = arith.constant 0 : i32
    return %c0_i32, %c0_i32_0 : i32, i32
  }
  func.func @transform_4(%arg0: i32) -> (i32, i32) {
    %c0_i32 = arith.constant 0 : i32
    %c0_i32_0 = arith.constant 0 : i32
    %c0_i32_1 = arith.constant 0 : i32
    return %c0_i32, %c0_i32_0 : i32, i32
  }
  func.func @transform_5(%arg0: i32) -> (i32, i32) {
    %c0_i32 = arith.constant 0 : i32
    %c0_i32_0 = arith.constant 0 : i32
    return %arg0, %c0_i32 : i32, i32
  }
}

</mosaic_0001>

<bundles_post_ra>
// kernel: tpu_custom_call.1
= control target key start
LH: loop header
LB: loop body
LE: loop exit
PB: predicated region body
PF: predicated region fallthrough
CT: control target
= control target key end

     0   :  { %10 = vsyncpa [#allocation3], 0  ;;  %s1227_s0 = inlined_call_operand.hbm [shape: f32[16,784], index: 0, kind: input, shape index: {}]   ;;  %s1228_s1 = inlined_call_operand.hbm [shape: bf16[784,128], index: 1, kind: input, shape index: {}]   ;;  %s1229_s2 = inlined_call_operand.vmem [shape: f32[1,128], index: 2, kind: input, shape index: {}]   ;;  %s1230_s3 = inlined_call_operand.hbm [shape: bf16[128,128], index: 3, kind: input, shape index: {}]   ;;  %s1231_s4 = inlined_call_operand.vmem [shape: f32[1,128], index: 4, kind: input, shape index: {}]   ;;  %s1232_s5 = inlined_call_operand.hbm [shape: f32[16,128], index: 5, kind: output, shape index: {}]  }
   0x1   :  { %11 = vsyncpa [#allocation6], 0 }
   0x2   :  { %12 = vsyncpa [#allocation4], 0  ;;  %s1112_s18 = smov [#allocation5]   ;;  %s1018_s22 = scalar_lea.hbm %s1228_s1, 6272 }
   0x3   :  { %s30_s19 = sshll.u32 %s1112_s18, 4  ;;  %p1019_p0 = scmp.ne.s32.totalorder %s1228_s1, %s1018_s22  ;;  %s31_s19 = int_to_ptr.vmem [resolvable:$true] %s30_s19 }
   0x4   :  { %p1022_p1 = scmp.lt.u32.totalorder %s1018_s22, %s1228_s1 }
   0x6   :  { %p1024_p2 = pnand %p1022_p1, %p1019_p0 }
   0x8   :  { %1027 = shalt.err (!%p1024_p2)
}
   0x9   :  { %s1028_s27 = scalar_lea.vmem %s31_s19, 6272  ;;  %p1033_p4 = scmp.lt.s32.totalorder %s31_s19, %s31_s19 }
   0xa   :  { %p1029_p3 = scmp.ne.s32.totalorder %s31_s19, %s1028_s27  ;;  %p1034_p5 = scmp.lt.s32.totalorder %s1028_s27, %s1028_s27 }
   0xc   :  { %p1035_p6 = por %p1034_p5, %p1033_p4 }
   0xe   :  { %p1036_p7 = pnand %p1035_p6, %p1029_p3 }
  0x10   :  { %1039 = shalt.err (!%p1036_p7)
}
  0x11   :  { %s1113_s28 = smov 64   ;;  %s1114_s29 = smov 4  }
  0x12   :  { %36 = dma.hbm_to_vmem [thread:$0]  %s1228_s1, 6272, %s31_s19, [#allocation6], %s1113_s28, %s1113_s28, %s1114_s29  }
  0x13   :  { %s1115_s7 = smov [#allocation2]   ;;  %s1040_s11 = scalar_lea.hbm %s1227_s0, 1792 }
  0x14   :  { %s18_s8 = sshll.u32 %s1115_s7, 4  ;;  %p1041_p8 = scmp.ne.s32.totalorder %s1227_s0, %s1040_s11  ;;  %s19_s8 = int_to_ptr.vmem [resolvable:$true] %s18_s8 }
  0x15   :  { %p1044_p9 = scmp.lt.u32.totalorder %s1040_s11, %s1227_s0 }
  0x17   :  { %p1046_p10 = pnand %p1044_p9, %p1041_p8 }
  0x19   :  { %1049 = shalt.err (!%p1046_p10)
}
  0x1a   :  { %s1050_s16 = scalar_lea.vmem %s19_s8, 1792  ;;  %p1055_p12 = scmp.lt.s32.totalorder %s19_s8, %s19_s8 }
  0x1b   :  { %p1051_p11 = scmp.ne.s32.totalorder %s19_s8, %s1050_s16  ;;  %p1056_p13 = scmp.lt.s32.totalorder %s1050_s16, %s1050_s16 }
  0x1d   :  { %p1057_p0 = por %p1056_p13, %p1055_p12 }
  0x1f   :  { %p1058_p1 = pnand %p1057_p0, %p1051_p11 }
  0x21   :  { %1061 = shalt.err (!%p1058_p1)
}
  0x22   :  { %s1116_s1 = smov 896   ;;  %s1117_s17 = smov 56  }
  0x23   :  { %24 = dma.hbm_to_vmem [thread:$0]  %s1227_s0, 1792, %s19_s8, [#allocation3], %s1116_s1, %s1116_s1, %s1117_s17  }
  0x24   :  { %s1118_s20 = smov [#allocation7]   ;;  %s1062_s24 = scalar_lea.hbm %s1230_s3, 1024 }
  0x25   :  { %s44_s21 = sshll.u32 %s1118_s20, 4  ;;  %p1063_p2 = scmp.ne.s32.totalorder %s1230_s3, %s1062_s24  ;;  %s45_s21 = int_to_ptr.vmem [resolvable:$true] %s44_s21 }
  0x26   :  { %p1066_p3 = scmp.lt.u32.totalorder %s1062_s24, %s1230_s3 }
  0x28   :  { %p1068_p4 = pnand %p1066_p3, %p1063_p2 }
  0x2a   :  { %1071 = shalt.err (!%p1068_p4)
}
  0x2b   :  { %s1072_s6 = scalar_lea.vmem %s45_s21, 1024  ;;  %p1077_p6 = scmp.lt.s32.totalorder %s45_s21, %s45_s21 }
  0x2c   :  { %p1073_p5 = scmp.ne.s32.totalorder %s45_s21, %s1072_s6  ;;  %p1078_p7 = scmp.lt.s32.totalorder %s1072_s6, %s1072_s6 }
  0x2e   :  { %p1079_p8 = por %p1078_p7, %p1077_p6 }
  0x30   :  { %p1080_p9 = pnand %p1079_p8, %p1073_p5 }
  0x32   :  { %1083 = shalt.err (!%p1080_p9)
}
  0x33   :  { %50 = dma.hbm_to_vmem [thread:$0]  %s1230_s3, 1024, %s45_s21, [#allocation6], %s1113_s28, %s1113_s28, %s1114_s29  }
  0x34   :  { %1106 = dma.done.wait [#allocation3], 1792  }
  0x35   :  { %1107 = vsyncadd [#allocation3], 4294965504 }
  0x36   :  { %1108 = dma.done.wait [#allocation6], 7296  }
  0x37   :  { %1109 = vsyncadd [#allocation6], 4294960000  ;;  %v961_v0 = vld [vmem:[#allocation5 + $0x40] sm:$0xff]   ;;  %v965_v4 = vld [vmem:[#allocation5 + $0x48] sm:$0xff]   ;;  %v1119_v43 = vmov 0.0   ;;  %vm1120_vm0 = vmmov 0  }
  0x38   :  { %v962_v1 = vld [vmem:[#allocation5] sm:$0xff]   ;;  %846 = vmatprep.subr.bf16.mxu0 %v961_v0  ;;  %v966_v5 = vld [vmem:[#allocation5 + $0x8] sm:$0xff]   ;;  %v969_v8 = vld [vmem:[#allocation5 + $0x50] sm:$0xff]   ;;  %vm483_vm1 = vcmask 130048   ;;  %s1121_s8 = smov [#allocation8]  }
  0x39   :  { %v963_v2 = vld [vmem:[#allocation5 + $0xc0] sm:$0xff]   ;;  %847 = vmatpush3.bf16.msra.mxu0 %v962_v1  ;;  %v967_v6 = vld [vmem:[#allocation5 + $0xc8] sm:$0xff]   ;;  %v970_v9 = vld [vmem:[#allocation5 + $0x10] sm:$0xff]   ;;  %s773_s9 = sshll.u32 %s1121_s8, 4  ;;  %s774_s9 = int_to_ptr.vmem [resolvable:$true] %s773_s9 }
  0x3a   :  { %v964_v3 = vld [vmem:[#allocation5 + $0x80] sm:$0xff]   ;;  %868 = vmatprep.subr.bf16.mxu1 %v963_v2  ;;  %848 = vmatprep.subr.bf16.mxu0 %v965_v4  ;;  %v968_v7 = vld [vmem:[#allocation5 + $0x88] sm:$0xff]   ;;  %v971_v10 = vld [vmem:[#allocation5 + $0xd0] sm:$0xff]   ;;  %s1084_s10 = scalar_lea.vmem %s774_s9, 256  ;;  %p1089_p11 = scmp.lt.s32.totalorder %s774_s9, %s774_s9 }
  0x3b   :  { %869 = vmatpush3.bf16.msra.mxu1 %v964_v3  ;;  %v972_v11 = vld [vmem:[#allocation5 + $0x90] sm:$0xff]   ;;  %v973_v12 = vld [vmem:[#allocation5 + $0x58] sm:$0xff]   ;;  %v977_v16 = vld [vmem:[#allocation5 + $0x60] sm:$0xff]   ;;  %p1085_p10 = scmp.ne.s32.totalorder %s774_s9, %s1084_s10  ;;  %p1090_p12 = scmp.lt.s32.totalorder %s1084_s10, %s1084_s10 }
  0x3c   :  { %870 = vmatprep.subr.bf16.mxu1 %v967_v6  ;;  %v974_v13 = vld [vmem:[#allocation5 + $0x18] sm:$0xff]   ;;  %v978_v17 = vld [vmem:[#allocation5 + $0x20] sm:$0xff]   ;;  %v981_v20 = vld [vmem:[#allocation5 + $0x68] sm:$0xff]  }
  0x3d   :  { %849 = vmatpush3.bf16.msra.mxu0 %v966_v5  ;;  %v975_v14 = vld [vmem:[#allocation5 + $0xd8] sm:$0xff]   ;;  %v979_v18 = vld [vmem:[#allocation5 + $0xe0] sm:$0xff]   ;;  %v982_v21 = vld [vmem:[#allocation5 + $0x28] sm:$0xff]   ;;  %p1091_p13 = por %p1090_p12, %p1089_p11 }
  0x3e   :  { %850 = vmatprep.subr.bf16.mxu0 %v969_v8  ;;  %v976_v15 = vld [vmem:[#allocation5 + $0x98] sm:$0xff]   ;;  %v980_v19 = vld [vmem:[#allocation5 + $0xa0] sm:$0xff]   ;;  %v983_v22 = vld [vmem:[#allocation5 + $0xe8] sm:$0xff]  }
  0x3f   :  { %871 = vmatpush3.bf16.msra.mxu1 %v968_v7  ;;  %v984_v23 = vld [vmem:[#allocation5 + $0xa8] sm:$0xff]   ;;  %v985_v24 = vld [vmem:[#allocation5 + $0x70] sm:$0xff]   ;;  %v989_v28 = vld [vmem:[#allocation5 + $0x78] sm:$0xff]   ;;  %p1092_p0 = pnand %p1091_p13, %p1085_p10 }
  0x40   :  { %872 = vmatprep.subr.bf16.mxu1 %v971_v10  ;;  %v986_v25 = vld [vmem:[#allocation5 + $0x30] sm:$0xff]   ;;  %v990_v29 = vld [vmem:[#allocation5 + $0x38] sm:$0xff]   ;;  %v70_v36 = vld [vmem:[#allocation2 + $0x38] sm:$0xff] }
  0x41   :  { %851 = vmatpush3.bf16.msra.mxu0 %v970_v9  ;;  %v987_v26 = vld [vmem:[#allocation5 + $0xf0] sm:$0xff]   ;;  %v991_v30 = vld [vmem:[#allocation5 + $0xf8] sm:$0xff]   ;;  %v993_v38 = vld [vmem:[#allocation5 + $0x140] sm:$0xff]  }
  0x42   :  { %852 = vmatprep.subr.bf16.mxu0 %v973_v12  ;;  %v988_v27 = vld [vmem:[#allocation5 + $0xb0] sm:$0xff]   ;;  %v64_v31 = vld [vmem:[#allocation2 + $0x8] sm:$0xff]  ;;  %v66_v39 = vld [vmem:[#allocation2 + $0x18] sm:$0xff] }
  0x43   :  { %873 = vmatpush3.bf16.msra.mxu1 %v972_v11  ;;  %v71_v32 = vld [vmem:[#allocation2 + $0x40] sm:$0xff]  ;;  %v992_v34 = vld [vmem:[#allocation5 + $0xb8] sm:$0xff]   ;;  %v73_v40 = vld [vmem:[#allocation2 + $0x50] sm:$0xff] }
  0x44   :  { %874 = vmatprep.subr.bf16.mxu1 %v975_v14  ;;  %v78_v33 = vpack.c.bf16 %v71_v32, %v64_v31  ;;  %v63_v35 = vld [vmem:[#allocation2] sm:$0xff]  ;;  %v80_v41 = vpack.c.bf16 %v73_v40, %v66_v39  ;;  %v994_v42 = vld [vmem:[#allocation5 + $0x100] sm:$0xff]   ;;  %v72_v45 = vld [vmem:[#allocation2 + $0x48] sm:$0xff] }
  0x45   :  { %853 = vmatpush3.bf16.msra.mxu0 %v974_v13  ;;  %v77_v37 = vpack.c.bf16 %v70_v36, %v63_v35  ;;  %v65_v44 = vld [vmem:[#allocation2 + $0x10] sm:$0xff]  ;;  %v995_v47 = vld [vmem:[#allocation5 + $0x148] sm:$0xff]   ;;  %v997_v49 = vld [vmem:[#allocation5 + $0x150] sm:$0xff]  }
  0x46   :  { %854 = vmatprep.subr.bf16.mxu0 %v977_v16  ;;  %519 = vmatprep.mubr.bf16.mxu0 %v78_v33  ;;  %v79_v46 = vpack.c.bf16 %v72_v45, %v65_v44  ;;  %v996_v48 = vld [vmem:[#allocation5 + $0x108] sm:$0xff]   ;;  %v998_v50 = vld [vmem:[#allocation5 + $0x110] sm:$0xff]   ;;  %v999_v51 = vld [vmem:[#allocation5 + $0x158] sm:$0xff]  }
  0x47   :  { %875 = vmatpush3.bf16.msra.mxu1 %v976_v15  ;;  %560 = vmatprep.mubr.bf16.mxu1 %v80_v41  ;;  %v1000_v52 = vld [vmem:[#allocation5 + $0x118] sm:$0xff]   ;;  %v1001_v53 = vld [vmem:[#allocation5 + $0x160] sm:$0xff]   ;;  %v1003_v55 = vld [vmem:[#allocation5 + $0x168] sm:$0xff]  }
  0x48   :  { %876 = vmatprep.subr.bf16.mxu1 %v979_v18  ;;  %v1002_v54 = vld [vmem:[#allocation5 + $0x120] sm:$0xff]   ;;  %v68_v57 = vld [vmem:[#allocation2 + $0x28] sm:$0xff]  ;;  %v1004_v58 = vld [vmem:[#allocation5 + $0x128] sm:$0xff]  }
  0x49   :  { %855 = vmatpush3.bf16.msra.mxu0 %v978_v17  ;;  %v1009_v56 = vld [vmem:[#allocation5 + $0x180] sm:$0xff]   ;;  %v1005_v59 = vld [vmem:[#allocation5 + $0x170] sm:$0xff]   ;;  %v76_v63 = vld [vmem:[#allocation2 + $0x68] sm:$0xff] }
  0x4a   :  { %856 = vmatprep.subr.bf16.mxu0 %v981_v20  ;;  %v75_v60 = vld [vmem:[#allocation2 + $0x60] sm:$0xff]  ;;  %v69_v62 = vld [vmem:[#allocation2 + $0x30] sm:$0xff]  ;;  %v1007_v2 = vld [vmem:[#allocation5 + $0x178] sm:$0xff]  }
  0x4b   :  { %877 = vmatpush3.bf16.msra.mxu1 %v980_v19  ;;  %v82_v61 = vpack.c.bf16 %v75_v60, %v68_v57  ;;  %v83_v0 = vpack.c.bf16 %v76_v63, %v69_v62  ;;  %v1006_v1 = vld [vmem:[#allocation5 + $0x130] sm:$0xff]   ;;  %v1008_v3 = vld [vmem:[#allocation5 + $0x138] sm:$0xff]   ;;  %v74_v5 = vld [vmem:[#allocation2 + $0x58] sm:$0xff] }
  0x4c   :  { %878 = vmatprep.subr.bf16.mxu1 %v983_v22  ;;  %v67_v4 = vld [vmem:[#allocation2 + $0x20] sm:$0xff]  ;;  %v1010_v7 = vld [vmem:[#allocation7] sm:$0xff]   ;;  %v1012_v9 = vld [vmem:[#allocation7 + $0x10] sm:$0xff]  }
  0x4d   :  { %857 = vmatpush3.bf16.msra.mxu0 %v982_v21  ;;  %v81_v6 = vpack.c.bf16 %v74_v5, %v67_v4  ;;  %v1011_v8 = vld [vmem:[#allocation7 + $0x8] sm:$0xff]   ;;  %v1013_v10 = vld [vmem:[#allocation7 + $0x18] sm:$0xff]   ;;  %v1014_v11 = vld [vmem:[#allocation7 + $0x20] sm:$0xff]  }
  0x4e   :  { %858 = vmatprep.subr.bf16.mxu0 %v985_v24  ;;  %v1015_v12 = vld [vmem:[#allocation7 + $0x28] sm:$0xff]   ;;  %v1016_v13 = vld [vmem:[#allocation7 + $0x30] sm:$0xff]   ;;  %v1017_v14 = vld [vmem:[#allocation7 + $0x38] sm:$0xff]  }
  0x4f   :  { %879 = vmatpush3.bf16.msra.mxu1 %v984_v23  ;;  %v786_v16 = vld [vmem:[%s1229_s2] ss:$0 sm:$0xff] }
  0x50   :  { %880 = vmatprep.subr.bf16.mxu1 %v987_v26 }
  0x51   :  { %859 = vmatpush3.bf16.msra.mxu0 %v986_v25 }
  0x52   :  { %860 = vmatprep.subr.bf16.mxu0 %v989_v28 }
  0x53   :  { %881 = vmatpush3.bf16.msra.mxu1 %v988_v27 }
  0x54   :  { %882 = vmatprep.subr.bf16.mxu1 %v991_v30 }
  0x55   :  { %861 = vmatpush3.bf16.msra.mxu0 %v990_v29 }
  0x56   :  { %890 = vmatprep.subr.bf16.mxu0 %v993_v38 }
  0x57   :  { %883 = vmatpush3.bf16.msra.mxu1 %v992_v34 }
  0x58   :  { %923 = vmatprep.subr.bf16.mxu1 %v1119_v43  ;;  %520 = vmatmul.mubr.bf16.vlgmr.msra.gmra.mrb[0].mxu0 %v77_v37 }
  0x59   :  { %891 = vmatpush3.bf16.msra.mxu0 %v994_v42  ;;  %601 = vmatprep.mubr.bf16.mxu0 %v82_v61 }
  0x5a   :  { %561 = vmatmul.mubr.bf16.vlgmr.msra.gmra.mrb[0].mxu1 %v79_v46  ;;  %892 = vmatprep.subr.bf16.mxu0 %v995_v47 }
  0x5b   :  { %925 = vmatprep.mubr.msk.bf16.mxu1 %vm1120_vm0, %v1119_v43  ;;  %924 = vmatpush3.bf16.msra.mxu1 %v1009_v56 }
  0x5c   :  { %929 = vmatprep.subr.bf16.mxu1 %v1119_v43 }
  0x5d   :  { %893 = vmatpush3.bf16.msra.mxu0 %v996_v48 }
  0x5e   :  { %894 = vmatprep.subr.bf16.mxu0 %v997_v49  ;;  %v837_v49 = vld [vmem:[%s1231_s4] ss:$0 sm:$0xff] }
  0x61   :  { %895 = vmatpush3.bf16.msra.mxu0 %v998_v50 }
  0x62   :  { %896 = vmatprep.subr.bf16.mxu0 %v999_v51  ;;  %926 = vmatmul.mubr.msk.bf16.vlgmr.msra.gmra.mrb[4].mxu1 %vm483_vm1, %v83_v0 }
  0x63   :  { %945 = vmatprep.mubr.msk.bf16.mxu1 %vm1120_vm0, %v1119_v43  ;;  %930 = vmatpush3.bf16.msra.mxu1 %v1010_v7 }
  0x64   :  { %931 = vmatprep.subr.bf16.mxu1 %v1119_v43 }
  0x65   :  { %897 = vmatpush3.bf16.msra.mxu0 %v1000_v52 }
  0x66   :  { %898 = vmatprep.subr.bf16.mxu0 %v1001_v53 }
  0x67   :  { %932 = vmatpush3.bf16.msra.mxu1 %v1011_v8 }
  0x68   :  { %933 = vmatprep.subr.bf16.mxu1 %v1119_v43 }
  0x69   :  { %899 = vmatpush3.bf16.msra.mxu0 %v1002_v54 }
  0x6a   :  { %900 = vmatprep.subr.bf16.mxu0 %v1003_v55 }
  0x6b   :  { %934 = vmatpush3.bf16.msra.mxu1 %v1012_v9 }
  0x6c   :  { %935 = vmatprep.subr.bf16.mxu1 %v1119_v43 }
  0x6d   :  { %901 = vmatpush3.bf16.msra.mxu0 %v1004_v58 }
  0x6e   :  { %902 = vmatprep.subr.bf16.mxu0 %v1005_v59 }
  0x6f   :  { %936 = vmatpush3.bf16.msra.mxu1 %v1013_v10 }
  0x70   :  { %937 = vmatprep.subr.bf16.mxu1 %v1119_v43 }
  0x71   :  { %903 = vmatpush3.bf16.msra.mxu0 %v1006_v1 }
  0x72   :  { %904 = vmatprep.subr.bf16.mxu0 %v1007_v2 }
  0x73   :  { %938 = vmatpush3.bf16.msra.mxu1 %v1014_v11 }
  0x74   :  { %939 = vmatprep.subr.bf16.mxu1 %v1119_v43 }
  0x75   :  { %905 = vmatpush3.bf16.msra.mxu0 %v1008_v3 }
  0x77   :  { %940 = vmatpush3.bf16.msra.mxu1 %v1015_v12 }
  0x78   :  { %602 = vmatmul.mubr.bf16.vlgmr.msra.gmra.mrb[4].mxu0 %v81_v6  ;;  %941 = vmatprep.subr.bf16.mxu1 %v1119_v43 }
  0x7b   :  { %942 = vmatpush3.bf16.msra.mxu1 %v1016_v13 }
  0x7c   :  { %943 = vmatprep.subr.bf16.mxu1 %v1119_v43 }
  0x7f   :  { %944 = vmatpush3.bf16.msra.mxu1 %v1017_v14 }
 0x12b   :  { %v862_v15 = vpop.f32.mrb[0].mxu0 }
 0x12c   :  { %v863_v17 = vpop.f32.mrb[1].mxu0 }
 0x12d   :  { %v864_v18 = vadd.f32 %v863_v17, %v862_v15  ;;  %v865_v19 = vpop.f32.mrb[2].mxu0  ;;  %v884_v20 = vpop.f32.mrb[0].mxu1 }
 0x12e   :  { %v866_v21 = vpop.f32.mrb[3].mxu0  ;;  %v885_v24 = vpop.f32.mrb[1].mxu1 }
 0x12f   :  { %v522_v22 = vadd.f32 %v864_v18, %v786_v16  ;;  %v867_v23 = vadd.f32 %v866_v21, %v865_v19  ;;  %v886_v25 = vadd.f32 %v885_v24, %v884_v20  ;;  %v887_v26 = vpop.f32.mrb[2].mxu1 }
 0x130   :  { %v888_v28 = vpop.f32.mrb[3].mxu1 }
 0x131   :  { %v525_v27 = vadd.f32 %v867_v23, %v786_v16  ;;  %v563_v29 = vadd.f32 %v886_v25, %v522_v22  ;;  %v889_v30 = vadd.f32 %v888_v28, %v887_v26 }
 0x133   :  { %v566_v31 = vadd.f32 %v889_v30, %v525_v27 }
 0x135   :  { %v644_v32 = vpop.f32.mrb[4].mxu1 }
 0x136   :  { %v927_v33 = vpop.f32.mrb[5].mxu1 }
 0x137   :  { %v647_v34 = vpop.f32.mrb[6].mxu1 }
 0x138   :  { %v928_v35 = vpop.f32.mrb[7].mxu1 }
 0x14b   :  { %v906_v36 = vpop.f32.mrb[4].mxu0 }
 0x14c   :  { %v907_v37 = vpop.f32.mrb[5].mxu0 }
 0x14d   :  { %v908_v38 = vadd.f32 %v907_v37, %v906_v36  ;;  %v909_v39 = vpop.f32.mrb[6].mxu0 }
 0x14e   :  { %v910_v40 = vpop.f32.mrb[7].mxu0 }
 0x14f   :  { %v604_v41 = vadd.f32 %v908_v38, %v563_v29  ;;  %v911_v42 = vadd.f32 %v910_v40, %v909_v39 }
 0x151   :  { %v645_v43 = vadd.f32 %v644_v32, %v604_v41  ;;  %v607_v44 = vadd.f32 %v911_v42, %v566_v31 }
 0x153   :  { %v648_v45 = vadd.f32 %v647_v34, %v607_v44  ;;  %v651_v46 = vmax.f32 %v645_v43, 0.0 }
 0x155   :  { %v652_v47 = vmax.f32 %v648_v45, 0.0 }
 0x157   :  { %v653_v48 = vpack.c.bf16 %v652_v47, %v651_v46 }
 0x159   :  { %946 = vmatmul.mubr.bf16.vlgmr.msra.gmra.mrb[8].mxu1 %v653_v48 }
 0x22c   :  { %v759_v50 = vpop.f32.mrb[8].mxu1 }
 0x22d   :  { %v760_v51 = vadd.f32 %v837_v49, %v759_v50  ;;  %v947_v52 = vpop.f32.mrb[9].mxu1 }
 0x22e   :  { %v762_v53 = vpop.f32.mrb[10].mxu1 }
 0x22f   :  { %766 = vst [vmem:[#allocation8] sm:$0xff] %v760_v51  ;;  %v763_v54 = vadd.f32 %v837_v49, %v762_v53  ;;  %v948_v55 = vpop.f32.mrb[11].mxu1 }
 0x231   :  { %767 = vst [vmem:[#allocation8 + $0x8] sm:$0xff] %v763_v54 }
 0x232   :  { %1095 = shalt.err (!%p1092_p0)
}
 0x233   :  { %s1096_s12 = scalar_lea.hbm %s1232_s5, 256 }
 0x234   :  { %p1097_p1 = scmp.ne.s32.totalorder %s1232_s5, %s1096_s12  ;;  %p1100_p2 = scmp.lt.u32.totalorder %s1096_s12, %s1232_s5 }
 0x236   :  { %p1102_p3 = pnand %p1100_p2, %p1097_p1 }
 0x238   :  { %1105 = shalt.err (!%p1102_p3)
}
 0x239   :  { %s1122_s1 = smov 128   ;;  %s1123_s17 = smov 8  }
 0x23a   :  { %779 = dma.vmem_to_hbm [thread:$0]  %s774_s9, 256, %s1232_s5, [#allocation4], %s1122_s1, %s1122_s1, %s1123_s17  }
 0x23b   :  { %1110 = dma.done.wait [#allocation4], 256  }
 0x23c   :  { %1111 = vsyncadd [#allocation4], 4294967040 }
 0x23d   :  { %783 = vsyncpa [#allocation3], 1 }
 0x23e   :  { %784 = vsyncpa [#allocation6], 1 }
 0x23f   :  { %785 = vsyncpa [#allocation4], 1 }

</bundles_post_ra>
